<compile_context>
chip_gen: v7x
topology: tpu7x:2x2x1
jax: 0.10.0
libtpu: 0.0.40
codegen_flags: <defaults>
</compile_context>

<pallas_src>
import jax
import jax.numpy as jnp
from jax.experimental import pallas as pl
from jax.experimental.pallas import tpu as pltpu

MEAN = 0.369
STD = 0.0255
INV_STD = 1.0 / STD  # constant multiply; differs from torch div by <= ~1 ulp

# ~2 MiB per block; with double-buffered input + output this is ~8 MiB of
# VMEM, comfortably under the v5e 16 MiB scoped default and v7x 64 MiB.
_VMEM_BLOCK_BUDGET_BYTES = 2 * 1024 * 1024


def _standardize_kernel(x_ref, o_ref):
    o_ref[...] = (x_ref[...] - MEAN) * INV_STD


def _as_lane_dense_2d(x):
    """Reshape to (rows, cols) with cols a large multiple of 128 when possible,
    so every vector store is a full, unmasked vst (lane-dense output)."""
    total = x.size
    for lanes in (1024, 512, 256, 128):
        if total % lanes == 0:
            return x.reshape(total // lanes, lanes)
    # Fallback for awkward total sizes: keep the original last dim as lanes.
    if x.ndim == 0:
        return x.reshape(1, 1)
    if x.ndim <= 1:
        return x.reshape(1, -1)
    return x.reshape(-1, x.shape[-1])


def _choose_tiles(rows, cols, itemsize):
    """Pick (tile_rows, tile_cols) from a VMEM byte budget while respecting the
    (8, 128) block-shape constraint (multiple-of or full-extent per dim)."""
    # Column tile: full dim if modest, else a 128-multiple chunk.  Partial
    # last blocks along either axis are handled by Pallas (cdiv grid).
    if cols <= 2048:
        tc = cols                      # full extent — always legal
    else:
        tc = 2048                      # multiple of 128 — legal
    # Row tile from the byte budget.
    budget_rows = max(1, _VMEM_BLOCK_BUDGET_BYTES // (tc * itemsize))
    if budget_rows >= rows:
        tr = rows                      # full extent — always legal
    else:
        tr = max(8, (budget_rows // 8) * 8)   # multiple of 8 — legal
        tr = min(tr, rows)
    return tr, tc


def standardize(x):
    """Apply (x - mean) / std elementwise via a Pallas TPU kernel.

    Accepts any shape; internally reshapes to a lane-dense 2D slab and
    reshapes back (semantics identical for an elementwise op).
    """
    orig_shape = x.shape
    x2 = _as_lane_dense_2d(x)
    rows, cols = x2.shape
    itemsize = jnp.dtype(x2.dtype).itemsize
    tr, tc = _choose_tiles(rows, cols, itemsize)
    grid = (pl.cdiv(rows, tr), pl.cdiv(cols, tc))

    nbytes = x2.size * itemsize
    out = pl.pallas_call(
        _standardize_kernel,
        out_shape=jax.ShapeDtypeStruct((rows, cols), x2.dtype),
        grid_spec=pltpu.PrefetchScalarGridSpec(
            num_scalar_prefetch=0,
            grid=grid,
            in_specs=[pl.BlockSpec((tr, tc), lambda i, j: (i, j))],
            out_specs=pl.BlockSpec((tr, tc), lambda i, j: (i, j)),
        ),
        compiler_params=pltpu.CompilerParams(
            dimension_semantics=("parallel", "parallel"),
        ),
        cost_estimate=pl.CostEstimate(
            flops=2 * x2.size,
            transcendentals=0,
            bytes_accessed=2 * nbytes,
        ),
    )(x2)
    return out.reshape(orig_shape)


if __name__ == "__main__":
    key = jax.random.PRNGKey(0)
    # Small NCHW input, e.g. batch=2, channels=4, spatial=16x16.
    x = jax.random.uniform(key, (2, 4, 16, 16), dtype=jnp.float32)

    y = standardize(x)
    jax.block_until_ready(y)

    # Correctness check against plain-JAX reference (exact division).
    y_ref = (x - MEAN) / STD
    assert y.shape == x.shape and y.dtype == x.dtype
    # Multiply-by-reciprocal differs from division by at most ~1 ulp.
    assert jnp.allclose(y, y_ref, rtol=1e-5, atol=1e-4), float(
        jnp.max(jnp.abs(y - y_ref))
    )

    print("KERNEL_OK")
</pallas_src>

<mosaic_0001>
module attributes {stable_mosaic.version = 11 : i64} {
  func.func @_standardize_kernel(%arg0: i32, %arg1: i32, %arg2: memref<2x1024xf32, #tpu.memory_space<vmem>>, %arg3: memref<2x1024xf32, #tpu.memory_space<vmem>>) attributes {dimension_semantics = [#tpu.dimension_semantics<parallel>, #tpu.dimension_semantics<parallel>], iteration_bounds = array<i64: 1, 1>, scalar_prefetch = 0 : i64, scratch_operands = 0 : i64, tpu.core_type = #tpu.core_type<tc>, window_params = [{transform_indices = @transform_0, window_bounds = array<i64: 2, 1024>}, {transform_indices = @transform_1, window_bounds = array<i64: 2, 1024>}]} {
    %c0 = arith.constant 0 : index
    %c0_0 = arith.constant 0 : index
    %0 = vector.load %arg2[%c0, %c0_0] : memref<2x1024xf32, #tpu.memory_space<vmem>>, vector<2x1024xf32>
    %cst = arith.constant 3.690000e-01 : f32
    %1 = vector.broadcast %cst : f32 to vector<2x1024xf32>
    %2 = arith.subf %0, %1 : vector<2x1024xf32>
    %cst_1 = arith.constant 39.2156868 : f32
    %3 = vector.broadcast %cst_1 : f32 to vector<2x1024xf32>
    %4 = arith.mulf %2, %3 : vector<2x1024xf32>
    %c0_2 = arith.constant 0 : index
    %c0_3 = arith.constant 0 : index
    %5 = vector.load %arg3[%c0_2, %c0_3] : memref<2x1024xf32, #tpu.memory_space<vmem>>, vector<2x1024xf32>
    tpu.vector_store %arg3[%c0_2, %c0_3], %4 {strides = array<i32>} : memref<2x1024xf32, #tpu.memory_space<vmem>>, vector<2x1024xf32>,
    return
  }
  func.func @transform_0(%arg0: i32, %arg1: i32) -> (i32, i32) {
    %c0_i32 = arith.constant 0 : i32
    return %arg0, %arg1 : i32, i32
  }
  func.func @transform_1(%arg0: i32, %arg1: i32) -> (i32, i32) {
    %c0_i32 = arith.constant 0 : i32
    return %arg0, %arg1 : i32, i32
  }
}

</mosaic_0001>

<bundles_post_ra>
// kernel: tpu_custom_call.1
= control target key start
LH: loop header
LB: loop body
LE: loop exit
PB: predicated region body
PF: predicated region fallthrough
CT: control target
= control target key end

     0   :  { %6 = vsyncpa [#allocation3], 0  ;;  %s132_s0 = inlined_call_operand.hbm [shape: f32[2,1024], index: 0, kind: input, shape index: {}]   ;;  %s133_s1 = inlined_call_operand.hbm [shape: f32[2,1024], index: 1, kind: output, shape index: {}]  }
   0x1   :  { %7 = vsyncpa [#allocation4], 0  ;;  %s96_s6 = smov [#allocation2]   ;;  %s48_s10 = scalar_lea.hbm %s132_s0, 256 }
   0x2   :  { %s14_s7 = sshll.u32 %s96_s6, 4  ;;  %p49_p0 = scmp.ne.s32.totalorder %s132_s0, %s48_s10  ;;  %s15_s7 = int_to_ptr.vmem [resolvable:$true] %s14_s7 }
   0x3   :  { %p52_p1 = scmp.lt.u32.totalorder %s48_s10, %s132_s0 }
   0x5   :  { %p54_p2 = pnand %p52_p1, %p49_p0 }
   0x7   :  { %57 = shalt.err (!%p54_p2)
}
   0x8   :  { %s58_s15 = scalar_lea.vmem %s15_s7, 256  ;;  %p63_p4 = scmp.lt.s32.totalorder %s15_s7, %s15_s7 }
   0x9   :  { %p59_p3 = scmp.ne.s32.totalorder %s15_s7, %s58_s15  ;;  %p64_p5 = scmp.lt.s32.totalorder %s58_s15, %s58_s15 }
   0xb   :  { %p65_p6 = por %p64_p5, %p63_p4 }
   0xd   :  { %p66_p7 = pnand %p65_p6, %p59_p3 }
   0xf   :  { %69 = shalt.err (!%p66_p7)
}
  0x10   :  { %17 = dma.hbm_to_vmem [thread:$0]  %s132_s0, 256, %s15_s7, [#allocation3]  }
  0x11   :  { %92 = dma.done.wait [#allocation3], 256  }
  0x12   :  { %93 = vsyncadd [#allocation3], 4294967040  ;;  %v21_v0 = vld [vmem:[#allocation2] sm:$0xff]  ;;  %v22_v1 = vld [vmem:[#allocation2 + $0x8] sm:$0xff]  ;;  %s97_s18 = smov [#allocation5]  }
  0x13   :  { %s35_s19 = sshll.u32 %s97_s18, 4  ;;  %v44_v2 = vadd.f32 -0.369, %v21_v0  ;;  %v45_v3 = vadd.f32 -0.369, %v22_v1  ;;  %s36_s19 = int_to_ptr.vmem [resolvable:$true] %s35_s19 }
  0x14   :  { %s70_s20 = scalar_lea.vmem %s36_s19, 256  ;;  %p75_p9 = scmp.lt.s32.totalorder %s36_s19, %s36_s19 }
  0x15   :  { %v25_v4 = vmul.f32 39.215687, %v44_v2  ;;  %v26_v5 = vmul.f32 39.215687, %v45_v3  ;;  %p71_p8 = scmp.ne.s32.totalorder %s36_s19, %s70_s20  ;;  %p76_p10 = scmp.lt.s32.totalorder %s70_s20, %s70_s20 }
  0x17   :  { %27 = vst [vmem:[#allocation5] sm:$0xff] %v25_v4  ;;  %28 = vst [vmem:[#allocation5 + $0x8] sm:$0xff] %v26_v5  ;;  %p77_p11 = por %p76_p10, %p75_p9 }
  0x19   :  { %p78_p12 = pnand %p77_p11, %p71_p8 }
  0x1b   :  { %81 = shalt.err (!%p78_p12)
}
  0x1c   :  { %s82_s22 = scalar_lea.hbm %s133_s1, 256 }
  0x1d   :  { %p83_p13 = scmp.ne.s32.totalorder %s133_s1, %s82_s22  ;;  %p86_p0 = scmp.lt.u32.totalorder %s82_s22, %s133_s1 }
  0x1f   :  { %p88_p1 = pnand %p86_p0, %p83_p13 }
  0x21   :  { %91 = shalt.err (!%p88_p1)
}
  0x22   :  { %38 = dma.vmem_to_hbm [thread:$0]  %s36_s19, 256, %s133_s1, [#allocation4]  }
  0x23   :  { %94 = dma.done.wait [#allocation4], 256  }
  0x24   :  { %95 = vsyncadd [#allocation4], 4294967040 }
  0x25   :  { %42 = vsyncpa [#allocation3], 1 }
  0x26   :  { %43 = vsyncpa [#allocation4], 1 }

</bundles_post_ra>
